<compile_context>
chip_gen: v5e
topology: v5e:2x2
jax: 0.10.0
libtpu: 0.0.40
codegen_flags: <defaults>
</compile_context>

<pallas_src>
import functools

import jax
import jax.numpy as jnp
from jax.experimental import pallas as pl
from jax.experimental.pallas import tpu as pltpu

LOG_SIG_MAX = 2.0
LOG_SIG_MIN = -20.0


def _round_up(x, m):
    return ((x + m - 1) // m) * m


def _policy_kernel(s_ref, w1_ref, b1_ref, w2_ref, b2_ref, wh_ref, bh_ref,
                   out_ref, *, num_actions):
    # Cast activations to bf16 only at the MXU boundary; keep VPU math in f32.
    x = s_ref[...].astype(jnp.bfloat16)

    # linear1 + ReLU
    h1 = jnp.dot(x, w1_ref[...], preferred_element_type=jnp.float32) + b1_ref[...]
    h1 = jnp.maximum(h1, 0.0)

    # linear2 + ReLU
    h2 = jnp.dot(h1.astype(jnp.bfloat16), w2_ref[...],
                 preferred_element_type=jnp.float32) + b2_ref[...]
    h2 = jnp.maximum(h2, 0.0)

    # Fused (and lane-padded) heads: one matmul producing
    # [mean | log_std | zero-pad] -> one lane-dense (tile_b, head_pad) store.
    heads = jnp.dot(h2.astype(jnp.bfloat16), wh_ref[...],
                    preferred_element_type=jnp.float32) + bh_ref[...]

    # Clamp only the log_std half (and the dead pad lanes, which are discarded
    # by the wrapper), lane-locally — no cross-lane data movement.
    col = jax.lax.broadcasted_iota(jnp.int32, heads.shape, dimension=1)
    is_log_std = col >= num_actions
    clamped = jnp.clip(heads, LOG_SIG_MIN, LOG_SIG_MAX)
    out_ref[...] = jnp.where(is_log_std, clamped, heads)


@functools.partial(jax.jit, static_argnames=("block_b",))
def gaussian_policy_forward(state, params, block_b=128):
    """Returns (mean, log_std), matching GaussianPolicy.forward."""
    w1, b1, w2, b2, wm, bm, wls, bls = params
    B, num_inputs = state.shape
    hidden = w1.shape[1]
    num_actions = wm.shape[1]

    # Fuse the two heads: (hidden, 2*A) weight, (1, 2*A) bias, then zero-pad
    # the lane (output) axis to a multiple of 128 so the kernel's output
    # store is lane-dense (unmasked vst) instead of a masked partial store.
    head_out = 2 * num_actions
    head_pad = _round_up(max(head_out, 128), 128)
    wh = jnp.concatenate([wm, wls], axis=1)
    bh = jnp.concatenate([bm, bls], axis=1)
    if head_pad != head_out:
        wh = jnp.pad(wh, ((0, 0), (0, head_pad - head_out)))
        bh = jnp.pad(bh, ((0, 0), (0, head_pad - head_out)))

    kernel = functools.partial(_policy_kernel, num_actions=num_actions)
    out_shape = jax.ShapeDtypeStruct((B, head_pad), jnp.float32)

    use_grid = (B % block_b == 0) and (B // block_b >= 2)
    if use_grid:
        # Batch-parallel grid: input/output tiled on batch, weights resident
        # full-array blocks. "parallel" lets v7x shard tiles across its 2 TCs.
        grid = (B // block_b,)
        in_specs = [
            pl.BlockSpec((block_b, num_inputs), lambda i: (i, 0)),
            pl.BlockSpec((num_inputs, hidden), lambda i: (0, 0)),
            pl.BlockSpec((1, hidden), lambda i: (0, 0)),
            pl.BlockSpec((hidden, hidden), lambda i: (0, 0)),
            pl.BlockSpec((1, hidden), lambda i: (0, 0)),
            pl.BlockSpec((hidden, head_pad), lambda i: (0, 0)),
            pl.BlockSpec((1, head_pad), lambda i: (0, 0)),
        ]
        out_specs = pl.BlockSpec((block_b, head_pad), lambda i: (i, 0))
        fused = pl.pallas_call(
            kernel,
            out_shape=out_shape,
            grid=grid,
            in_specs=in_specs,
            out_specs=out_specs,
            compiler_params=pltpu.CompilerParams(
                dimension_semantics=("parallel",)),
        )(state, w1, b1, w2, b2, wh, bh)
    else:
        # Grid-less, full-array VMEM blocks: correct structure for a few-KB
        # problem (no extra grid steps, no scratch, no manual DMA).
        vmem = pl.BlockSpec(memory_space=pltpu.MemorySpace.VMEM)
        fused = pl.pallas_call(
            kernel,
            out_shape=out_shape,
            in_specs=[vmem] * 7,
            out_specs=vmem,
        )(state, w1, b1, w2, b2, wh, bh)

    mean = fused[:, :num_actions]
    log_std = fused[:, num_actions:head_out]
    return mean, log_std


def _xavier_uniform(key, fan_in, fan_out, dtype=jnp.bfloat16):
    bound = (6.0 / (fan_in + fan_out)) ** 0.5
    w = jax.random.uniform(key, (fan_in, fan_out), dtype=jnp.float32,
                           minval=-bound, maxval=bound)
    return w.astype(dtype)


def init_params(key, num_inputs, num_actions, hidden_dim):
    k1, k2, k3, k4 = jax.random.split(key, 4)
    # Weights bf16 (MXU-native, half the DMA bytes); biases f32 kept 2D (1, out).
    w1 = _xavier_uniform(k1, num_inputs, hidden_dim)
    b1 = jnp.zeros((1, hidden_dim), jnp.float32)
    w2 = _xavier_uniform(k2, hidden_dim, hidden_dim)
    b2 = jnp.zeros((1, hidden_dim), jnp.float32)
    wm = _xavier_uniform(k3, hidden_dim, num_actions)
    bm = jnp.zeros((1, num_actions), jnp.float32)
    wls = _xavier_uniform(k4, hidden_dim, num_actions)
    bls = jnp.zeros((1, num_actions), jnp.float32)
    return (w1, b1, w2, b2, wm, bm, wls, bls)


def reference_forward(state, params):
    """Pure-JAX reference with the same bf16-input / f32-accumulate math."""
    w1, b1, w2, b2, wm, bm, wls, bls = params

    def mm(x, w):
        return jnp.dot(x.astype(jnp.bfloat16), w.astype(jnp.bfloat16),
                       preferred_element_type=jnp.float32)

    h1 = jnp.maximum(mm(state, w1) + b1, 0.0)
    h2 = jnp.maximum(mm(h1, w2) + b2, 0.0)
    mean = mm(h2, wm) + bm
    log_std = jnp.clip(mm(h2, wls) + bls, LOG_SIG_MIN, LOG_SIG_MAX)
    return mean, log_std


if __name__ == "__main__":
    B, NUM_INPUTS, NUM_ACTIONS, HIDDEN = 2, 16, 8, 32

    key = jax.random.PRNGKey(0)
    k_state, k_params, k_big = jax.random.split(key, 3)
    params = init_params(k_params, NUM_INPUTS, NUM_ACTIONS, HIDDEN)

    # --- small-batch path (grid-less, full-array VMEM blocks) ---
    state = jax.random.normal(k_state, (B, NUM_INPUTS), dtype=jnp.float32)
    mean, log_std = gaussian_policy_forward(state, params)
    jax.block_until_ready((mean, log_std))

    mean_ref, log_std_ref = reference_forward(state, params)
    assert mean.shape == (B, NUM_ACTIONS) and log_std.shape == (B, NUM_ACTIONS)
    assert jnp.allclose(mean, mean_ref, atol=1e-2, rtol=1e-2)
    assert jnp.allclose(log_std, log_std_ref, atol=1e-2, rtol=1e-2)

    # --- large-batch path (batch-parallel grid, weights resident) ---
    BIG_B = 512
    state_big = jax.random.normal(k_big, (BIG_B, NUM_INPUTS), dtype=jnp.float32)
    mean_b, log_std_b = gaussian_policy_forward(state_big, params, block_b=128)
    jax.block_until_ready((mean_b, log_std_b))

    mean_br, log_std_br = reference_forward(state_big, params)
    assert mean_b.shape == (BIG_B, NUM_ACTIONS)
    assert jnp.allclose(mean_b, mean_br, atol=1e-2, rtol=1e-2)
    assert jnp.allclose(log_std_b, log_std_br, atol=1e-2, rtol=1e-2)

    # TODO(synk): GaussianPolicy.sample() (reparameterized Normal sampling,
    # tanh squash, log_prob correction) stays in plain JAX; the requested
    # forward() is fully implemented in the kernel.
    print("KERNEL_OK")
</pallas_src>

<mosaic_0001>
module attributes {stable_mosaic.version = 11 : i64} {
  func.func @_policy_kernel(%arg0: memref<2x16xf32, #tpu.memory_space<vmem>>, %arg1: memref<16x32xbf16, #tpu.memory_space<vmem>>, %arg2: memref<1x32xf32, #tpu.memory_space<vmem>>, %arg3: memref<32x32xbf16, #tpu.memory_space<vmem>>, %arg4: memref<1x32xf32, #tpu.memory_space<vmem>>, %arg5: memref<32x128xbf16, #tpu.memory_space<vmem>>, %arg6: memref<1x128xf32, #tpu.memory_space<vmem>>, %arg7: memref<2x128xf32, #tpu.memory_space<vmem>>) attributes {dimension_semantics = [], scalar_prefetch = 0 : i64, scratch_operands = 0 : i64, tpu.core_type = #tpu.core_type<tc>} {
    %c0 = arith.constant 0 : index
    %c0_0 = arith.constant 0 : index
    %0 = vector.load %arg0[%c0, %c0_0] : memref<2x16xf32, #tpu.memory_space<vmem>>, vector<2x16xf32>
    %1 = arith.truncf %0 : vector<2x16xf32> to vector<2x16xbf16>
    %c0_1 = arith.constant 0 : index
    %c0_2 = arith.constant 0 : index
    %2 = vector.load %arg1[%c0_1, %c0_2] : memref<16x32xbf16, #tpu.memory_space<vmem>>, vector<16x32xbf16>
    %cst = arith.constant dense<0.000000e+00> : vector<2x32xf32>
    %3 = tpu.matmul %1, %2, %cst {dimension_numbers = #tpu.dot_dimension_numbers<[1], [0], [0], [1], [0, 0, 1, 1], [], []>} : vector<2x16xbf16>, vector<16x32xbf16>, vector<2x32xf32> -> vector<2x32xf32>
    %c0_3 = arith.constant 0 : index
    %c0_4 = arith.constant 0 : index
    %4 = vector.load %arg2[%c0_3, %c0_4] : memref<1x32xf32, #tpu.memory_space<vmem>>, vector<1x32xf32>
    %5 = vector.broadcast %4 : vector<1x32xf32> to vector<2x32xf32>
    %6 = arith.addf %3, %5 : vector<2x32xf32>
    %cst_5 = arith.constant 0.000000e+00 : f32
    %7 = vector.broadcast %cst_5 : f32 to vector<2x32xf32>
    %8 = arith.maximumf %6, %7 : vector<2x32xf32>
    %9 = arith.truncf %8 : vector<2x32xf32> to vector<2x32xbf16>
    %c0_6 = arith.constant 0 : index
    %c0_7 = arith.constant 0 : index
    %10 = vector.load %arg3[%c0_6, %c0_7] : memref<32x32xbf16, #tpu.memory_space<vmem>>, vector<32x32xbf16>
    %cst_8 = arith.constant dense<0.000000e+00> : vector<2x32xf32>
    %11 = tpu.matmul %9, %10, %cst_8 {dimension_numbers = #tpu.dot_dimension_numbers<[1], [0], [0], [1], [0, 0, 1, 1], [], []>} : vector<2x32xbf16>, vector<32x32xbf16>, vector<2x32xf32> -> vector<2x32xf32>
    %c0_9 = arith.constant 0 : index
    %c0_10 = arith.constant 0 : index
    %12 = vector.load %arg4[%c0_9, %c0_10] : memref<1x32xf32, #tpu.memory_space<vmem>>, vector<1x32xf32>
    %13 = vector.broadcast %12 : vector<1x32xf32> to vector<2x32xf32>
    %14 = arith.addf %11, %13 : vector<2x32xf32>
    %cst_11 = arith.constant 0.000000e+00 : f32
    %15 = vector.broadcast %cst_11 : f32 to vector<2x32xf32>
    %16 = arith.maximumf %14, %15 : vector<2x32xf32>
    %17 = arith.truncf %16 : vector<2x32xf32> to vector<2x32xbf16>
    %c0_12 = arith.constant 0 : index
    %c0_13 = arith.constant 0 : index
    %18 = vector.load %arg5[%c0_12, %c0_13] : memref<32x128xbf16, #tpu.memory_space<vmem>>, vector<32x128xbf16>
    %cst_14 = arith.constant dense<0.000000e+00> : vector<2x128xf32>
    %19 = tpu.matmul %17, %18, %cst_14 {dimension_numbers = #tpu.dot_dimension_numbers<[1], [0], [0], [1], [0, 0, 1, 1], [], []>} : vector<2x32xbf16>, vector<32x128xbf16>, vector<2x128xf32> -> vector<2x128xf32>
    %c0_15 = arith.constant 0 : index
    %c0_16 = arith.constant 0 : index
    %20 = vector.load %arg6[%c0_15, %c0_16] : memref<1x128xf32, #tpu.memory_space<vmem>>, vector<1x128xf32>
    %21 = vector.broadcast %20 : vector<1x128xf32> to vector<2x128xf32>
    %22 = arith.addf %19, %21 : vector<2x128xf32>
    %23 = tpu.iota {dimensions = array<i32: 1>} : vector<2x128xi32>
    %c8_i32 = arith.constant 8 : i32
    %24 = vector.broadcast %c8_i32 : i32 to vector<2x128xi32>
    %25 = arith.cmpi sge, %23, %24 : vector<2x128xi32>
    %cst_17 = arith.constant -2.000000e+01 : f32
    %cst_18 = arith.constant 2.000000e+00 : f32
    %26 = vector.broadcast %cst_17 : f32 to vector<2x128xf32>
    %27 = arith.maximumf %26, %22 : vector<2x128xf32>
    %28 = vector.broadcast %cst_18 : f32 to vector<2x128xf32>
    %29 = arith.minimumf %28, %27 : vector<2x128xf32>
    %30 = arith.select %25, %29, %22 : vector<2x128xi1>, vector<2x128xf32>
    %c0_19 = arith.constant 0 : index
    %c0_20 = arith.constant 0 : index
    %31 = vector.load %arg7[%c0_19, %c0_20] : memref<2x128xf32, #tpu.memory_space<vmem>>, vector<2x128xf32>
    tpu.vector_store %arg7[%c0_19, %c0_20], %30 {strides = array<i32>} : memref<2x128xf32, #tpu.memory_space<vmem>>, vector<2x128xf32>,
    return
  }
}

</mosaic_0001>

<bundles_post_ra>
// kernel: gaussian_policy_forward.1
= control target key start
LH: loop header
LB: loop body
LE: loop exit
PB: predicated region body
PF: predicated region fallthrough
CT: control target
= control target key end

     0   :  { %vm41_vm0 = vcmask 130048   ;;  %vm80_vm1 = vcmask 261120   ;;  %v135_v19 = vlaneseq  ;;  %s247_s1 = inlined_call_operand.vmem [shape: bf16[16,32], index: 1, kind: input, shape index: {}]   ;;  %s248_s0 = inlined_call_operand.vmem [shape: f32[2,16], index: 0, kind: input, shape index: {}]   ;;  %s249_s2 = inlined_call_operand.vmem [shape: f32[1,32], index: 2, kind: input, shape index: {}]   ;;  %s250_s4 = inlined_call_operand.vmem [shape: f32[1,32], index: 4, kind: input, shape index: {}]   ;;  %s251_s3 = inlined_call_operand.vmem [shape: bf16[32,32], index: 3, kind: input, shape index: {}]   ;;  %s252_s6 = inlined_call_operand.vmem [shape: f32[1,128], index: 6, kind: input, shape index: {}]   ;;  %s253_s5 = inlined_call_operand.vmem [shape: bf16[32,128], index: 5, kind: input, shape index: {}]   ;;  %s254_s7 = inlined_call_operand.vmem [shape: f32[2,128], index: 7, kind: output, shape index: {}]  }
   0x1   :  { %v169_v0 = vld [vmem:[%s247_s1] sm:$0xff]  ;;  %v171_v3 = vld [vmem:[%s251_s3 + $0x8] sm:$0xff] }
   0x2   :  { %v27_v1 = vld [vmem:[%s248_s0] sm:$0x3]  ;;  %52 = vmatpush.bf16.msra.mxu0 %v169_v0  ;;  %90 = vmatpush.bf16.msra.mxu1 %v171_v3  ;;  %v173_v11 = vld [vmem:[%s253_s5 + $0x8] sm:$0xff]  ;;  %v136_v22 = vand.u32 127, %v135_v19 }
   0x3   :  { %v28_v2 = vpack.c.bf16 %v27_v1, %v27_v1  ;;  %v170_v4 = vld [vmem:[%s251_s3] sm:$0xff]  ;;  %128 = vmatpush.bf16.msra.mxu2 %v173_v11 }
   0x4   :  { %v174_v5 = vld [vmem:[%s249_s2] ss:$0 sm:$0xff]  ;;  %vm137_vm2 = vcmp.ge.s32.totalorder %v136_v22, 8 }
   0x5   :  { %150 = vmatmul.msk.bf16.vlgmr.msra.gmra.mxu0 %vm41_vm0, %v28_v2  ;;  %v172_v12 = vld [vmem:[%s253_s5] sm:$0xff] }
   0x6   :  { %91 = vmatpush.bf16.msra.mxu1 %v170_v4  ;;  %v175_v13 = vld [vmem:[%s250_s4] ss:$0 sm:$0xff] }
   0x7   :  { %129 = vmatpush.bf16.msra.mxu2 %v172_v12  ;;  %v176_v20 = vld [vmem:[%s252_s6] ss:$0 sm:$0xff] }
  0x82   :  { %v54_v6 = vpop.f32.mrf.mxu0 }
  0x83   :  { %v55_v7 = vadd.f32 %v174_v5, %v54_v6 }
  0x85   :  { %v58_v8 = vmax.f32 %v55_v7, 0.0 }
  0x87   :  { %v59_v9 = vpack.c.bf16 %v58_v8, %v58_v8 }
  0x89   :  { %159 = vmatmul.msk.bf16.vlgmr.msra.gmra.mxu1 %vm80_vm1, %v59_v9 }
  0x8a   :  { %v56_v10 = vpop.f32.mrf.mxu0 }
 0x106   :  { %v93_v14 = vpop.f32.mrf.mxu1 }
 0x107   :  { %v94_v15 = vadd.f32 %v175_v13, %v93_v14 }
 0x109   :  { %v97_v16 = vmax.f32 %v94_v15, 0.0 }
 0x10b   :  { %v98_v17 = vpack.c.bf16 %v97_v16, %v97_v16 }
 0x10d   :  { %168 = vmatmul.msk.bf16.vlgmr.msra.gmra.mxu2 %vm80_vm1, %v98_v17 }
 0x10e   :  { %v95_v18 = vpop.f32.mrf.mxu1 }
 0x190   :  { %v131_v21 = vpop.f32.mrf.mxu2 }
 0x191   :  { %v132_v23 = vadd.f32 %v176_v20, %v131_v21 }
 0x193   :  { %v138_v24 = vmax.f32 %v132_v23, -20.0 }
 0x195   :  { %v139_v25 = vmin.f32 %v138_v24, 2.0 }
 0x197   :  { %v140_v26 = vsel %vm137_vm2, %v139_v25, %v132_v23 }
 0x198   :  { %141 = vst [vmem:[%s254_s7] sm:$0x3] %v140_v26  ;;  %v133_v27 = vpop.f32.mrf.mxu2 }

</bundles_post_ra>
